<compile_context>
chip_gen: v5e
topology: v5e:2x2
jax: 0.10.0
libtpu: 0.0.40
codegen_flags: <defaults>
</compile_context>

<pallas_src>
import functools

import jax
import jax.numpy as jnp
from jax.experimental import pallas as pl
from jax.experimental.pallas import tpu as pltpu

LANES = 128


def _round_up(n, m):
    return ((n + m - 1) // m) * m


def _pick_block_rows(rows):
    """Per-generation block height (rows of 128 lanes, f32 => rows*512 bytes)."""
    try:
        kind = jax.devices()[0].device_kind.lower()
    except Exception:  # pragma: no cover - defensive
        kind = ""
    if "v5" in kind:
        target = 2048   # 1 MiB/block; 2 inputs x 2 bufs (+ out) < 16 MiB scoped VMEM
    elif "v7" in kind or "7x" in kind:
        target = 8192   # 4 MiB/block; ~1.6 TB/s per-TC HBM, amortize step overhead
    else:
        target = 4096   # v6e & default: 2 MiB/block, ~8-12 MiB total, safe everywhere
    return min(target, _round_up(rows, 16))


def _focal_terms(x, t, alpha, gamma, binary_targets):
    """Elementwise focal loss in f32 (matches the PyTorch module)."""
    x = x.astype(jnp.float32)
    t = t.astype(jnp.float32)
    e = jnp.exp(-jnp.abs(x))
    # Numerically-stable BCE with logits (== F.binary_cross_entropy_with_logits):
    #   bce = max(x, 0) - x*t + log1p(exp(-|x|))
    bce = jnp.maximum(x, 0.0) - x * t + jnp.log1p(e)
    if binary_targets:
        # pt = exp(-bce) = exp(x*t - max(x,0)) / (1 + e); for t in {0,1} the
        # numerator is a select between 1 and e -> no second exp, EUP vrcp only.
        num = jnp.where(t >= 0.5,
                        jnp.where(x >= 0.0, 1.0, e),
                        jnp.where(x >= 0.0, e, 1.0))
        pt = num * pl.reciprocal(1.0 + e, approx=True)
    else:
        pt = jnp.exp(-bce)
    omp = 1.0 - pt
    if gamma == 2.0:            # module default: avoid pow -> exp(gamma*log(.))
        focal = omp * omp
    elif gamma == 1.0:
        focal = omp
    elif gamma == 0.0:
        focal = jnp.ones_like(omp)
    else:
        focal = jnp.power(omp, gamma)
    return alpha * focal * bce


def _focal_partial_sum_kernel(x_ref, t_ref, o_ref, *, alpha, gamma,
                              binary_targets, rows, block_rows, need_row_mask):
    f = _focal_terms(x_ref[...], t_ref[...], alpha, gamma, binary_targets)

    def fold(v):
        # Fold the block to one (8,128) vreg-shaped partial (pure VPU adds);
        # the expensive cross-lane reduction happens once, in the wrapper.
        return v.reshape(-1, 8, LANES).sum(axis=0)

    if need_row_mask:
        last = pl.num_programs(0) - 1

        @pl.when(pl.program_id(0) == last)
        def _():
            # Only the final block overhangs the (rows, 128) array: zero the
            # undefined overhang rows before summing.
            row = jax.lax.broadcasted_iota(jnp.int32, (block_rows, LANES), 0)
            in_bounds = (last * block_rows + row) < rows
            o_ref[...] = fold(jnp.where(in_bounds, f, 0.0))

        @pl.when(pl.program_id(0) != last)
        def _():
            o_ref[...] = fold(f)
    else:
        o_ref[...] = fold(f)


def _focal_elementwise_kernel(x_ref, t_ref, o_ref, *, alpha, gamma,
                              binary_targets):
    o_ref[...] = _focal_terms(x_ref[...], t_ref[...], alpha, gamma,
                              binary_targets).astype(o_ref.dtype)


def focal_loss(inputs, targets, *, alpha=0.25, gamma=2.0, reduction="mean",
               binary_targets=False):
    """Pallas TPU focal loss. reduction in {'mean', 'sum', 'none'}.

    binary_targets=True assumes targets in {0, 1} and uses an approx-reciprocal
    fast path (drops one exp per element); default False is exact.
    """
    assert inputs.shape == targets.shape, "inputs/targets shape mismatch"
    orig_shape = inputs.shape
    total = int(inputs.size)
    in_dtype = inputs.dtype

    lane_pad = (-total) % LANES
    rows = (total + lane_pad) // LANES

    x_flat = inputs.reshape(-1)
    t_flat = targets.reshape(-1)
    if lane_pad:
        # Rare ragged case (total % 128 != 0): pad <128 elems with (x=100, t=1),
        # whose focal loss is exactly 0 -> no lane mask needed in the kernel.
        # TODO(synk): a tiny jnp tail path would avoid this full-copy pad.
        x_flat = jnp.pad(x_flat, (0, lane_pad), constant_values=100.0)
        t_flat = jnp.pad(t_flat, (0, lane_pad), constant_values=1.0)
    x2d = x_flat.reshape(rows, LANES)
    t2d = t_flat.reshape(rows, LANES)

    block_rows = _pick_block_rows(rows)
    num_tiles = pl.cdiv(rows, block_rows)
    need_row_mask = num_tiles * block_rows != rows  # last block overhangs rows

    in_specs = [
        pl.BlockSpec((block_rows, LANES), lambda i: (i, 0)),
        pl.BlockSpec((block_rows, LANES), lambda i: (i, 0)),
    ]
    compiler_params = pltpu.CompilerParams(dimension_semantics=("parallel",))

    if reduction in ("mean", "sum"):
        kernel = functools.partial(
            _focal_partial_sum_kernel,
            alpha=float(alpha), gamma=float(gamma), binary_targets=binary_targets,
            rows=rows, block_rows=block_rows, need_row_mask=need_row_mask)
        partials = pl.pallas_call(
            kernel,
            out_shape=jax.ShapeDtypeStruct((num_tiles * 8, LANES), jnp.float32),
            grid=(num_tiles,),
            in_specs=in_specs,
            out_specs=pl.BlockSpec((8, LANES), lambda i: (i, 0)),
            compiler_params=compiler_params,
        )(x2d, t2d)
        s = jnp.sum(partials)
        if reduction == "mean":
            return s * (1.0 / total)
        return s

    if reduction == "none":
        kernel = functools.partial(
            _focal_elementwise_kernel,
            alpha=float(alpha), gamma=float(gamma), binary_targets=binary_targets)
        out = pl.pallas_call(
            kernel,
            out_shape=jax.ShapeDtypeStruct((rows, LANES), in_dtype),
            grid=(num_tiles,),
            in_specs=in_specs,
            out_specs=pl.BlockSpec((block_rows, LANES), lambda i: (i, 0)),
            compiler_params=compiler_params,
        )(x2d, t2d)
        if lane_pad:
            return out.reshape(-1)[:total].reshape(orig_shape)
        return out.reshape(orig_shape)

    raise ValueError(f"unknown reduction: {reduction!r}")


def _focal_loss_ref(inputs, targets, alpha=0.25, gamma=2.0, reduction="mean"):
    x = inputs.astype(jnp.float32)
    t = targets.astype(jnp.float32)
    bce = jnp.maximum(x, 0.0) - x * t + jnp.log1p(jnp.exp(-jnp.abs(x)))
    pt = jnp.exp(-bce)
    f = alpha * (1.0 - pt) ** gamma * bce
    if reduction == "mean":
        return jnp.mean(f)
    if reduction == "sum":
        return jnp.sum(f)
    return f


if __name__ == "__main__":
    key = jax.random.PRNGKey(0)
    k1, k2, k3, k4 = jax.random.split(key, 4)

    # Small NCHW-style shape: batch=2, channels=4, spatial=16x16 -> 2048 elems.
    shape = (2, 4, 16, 16)
    inputs = jax.random.normal(k1, shape, dtype=jnp.float32)
    targets = jax.random.bernoulli(k2, p=0.5, shape=shape).astype(jnp.float32)

    loss = jax.block_until_ready(focal_loss(inputs, targets))
    ref = _focal_loss_ref(inputs, targets)
    assert jnp.allclose(loss, ref, rtol=1e-5, atol=1e-6), (loss, ref)

    # Odd (non-128-divisible) shape exercises the pad + last-tile row-mask path.
    shape2 = (3, 5, 7, 11)
    inputs2 = jax.random.normal(k3, shape2, dtype=jnp.float32)
    targets2 = jax.random.bernoulli(k4, p=0.5, shape=shape2).astype(jnp.float32)

    loss2 = jax.block_until_ready(focal_loss(inputs2, targets2, reduction="mean"))
    ref2 = _focal_loss_ref(inputs2, targets2, reduction="mean")
    assert jnp.allclose(loss2, ref2, rtol=1e-5, atol=1e-6), (loss2, ref2)

    loss2s = jax.block_until_ready(focal_loss(inputs2, targets2, reduction="sum"))
    ref2s = _focal_loss_ref(inputs2, targets2, reduction="sum")
    assert jnp.allclose(loss2s, ref2s, rtol=1e-5, atol=1e-5), (loss2s, ref2s)

    loss2n = jax.block_until_ready(focal_loss(inputs2, targets2, reduction="none"))
    ref2n = _focal_loss_ref(inputs2, targets2, reduction="none")
    assert loss2n.shape == shape2 and loss2n.dtype == inputs2.dtype
    assert jnp.allclose(loss2n, ref2n, rtol=1e-5, atol=1e-6)

    # bf16 inputs: 'none' path preserves dtype (HBM-store traffic saving).
    inputs_bf = inputs.astype(jnp.bfloat16)
    targets_bf = targets.astype(jnp.bfloat16)
    loss_bf = jax.block_until_ready(
        focal_loss(inputs_bf, targets_bf, reduction="none"))
    ref_bf = _focal_loss_ref(inputs_bf, targets_bf, reduction="none")
    assert loss_bf.dtype == jnp.bfloat16 and loss_bf.shape == shape
    assert jnp.allclose(loss_bf.astype(jnp.float32), ref_bf, rtol=2e-2, atol=2e-2)

    # Optional binary-target fast path (one exp removed, approx reciprocal).
    loss_bt = jax.block_until_ready(
        focal_loss(inputs2, targets2, reduction="mean", binary_targets=True))
    assert jnp.allclose(loss_bt, ref2, rtol=5e-3, atol=1e-5), (loss_bt, ref2)

    print("KERNEL_OK")
</pallas_src>

<mosaic_0001>
module attributes {stable_mosaic.version = 11 : i64} {
  func.func @_focal_partial_sum_kernel(%arg0: i32, %arg1: memref<16x128xf32, #tpu.memory_space<vmem>>, %arg2: memref<16x128xf32, #tpu.memory_space<vmem>>, %arg3: memref<8x128xf32, #tpu.memory_space<vmem>>) attributes {dimension_semantics = [#tpu.dimension_semantics<parallel>], iteration_bounds = array<i64: 1>, scalar_prefetch = 0 : i64, scratch_operands = 0 : i64, tpu.core_type = #tpu.core_type<tc>, window_params = [{transform_indices = @transform_0, window_bounds = array<i64: 16, 128>}, {transform_indices = @transform_1, window_bounds = array<i64: 16, 128>}, {transform_indices = @transform_2, window_bounds = array<i64: 8, 128>}]} {
    %c0 = arith.constant 0 : index
    %c0_0 = arith.constant 0 : index
    %0 = vector.load %arg1[%c0, %c0_0] : memref<16x128xf32, #tpu.memory_space<vmem>>, vector<16x128xf32>
    %c0_1 = arith.constant 0 : index
    %c0_2 = arith.constant 0 : index
    %1 = vector.load %arg2[%c0_1, %c0_2] : memref<16x128xf32, #tpu.memory_space<vmem>>, vector<16x128xf32>
    %2 = math.absf %0 : vector<16x128xf32>
    %cst = arith.constant 0.000000e+00 : f32
    %3 = vector.broadcast %cst : f32 to vector<16x128xf32>
    %4 = arith.subf %3, %2 : vector<16x128xf32>
    %5 = math.exp %4 : vector<16x128xf32>
    %cst_3 = arith.constant 0.000000e+00 : f32
    %6 = vector.broadcast %cst_3 : f32 to vector<16x128xf32>
    %7 = arith.maximumf %0, %6 : vector<16x128xf32>
    %8 = arith.mulf %0, %1 : vector<16x128xf32>
    %9 = arith.subf %7, %8 : vector<16x128xf32>
    %10 = math.log1p %5 : vector<16x128xf32>
    %11 = arith.addf %9, %10 : vector<16x128xf32>
    %cst_4 = arith.constant 0.000000e+00 : f32
    %12 = vector.broadcast %cst_4 : f32 to vector<16x128xf32>
    %13 = arith.subf %12, %11 : vector<16x128xf32>
    %14 = math.exp %13 : vector<16x128xf32>
    %cst_5 = arith.constant 1.000000e+00 : f32
    %15 = vector.broadcast %cst_5 : f32 to vector<16x128xf32>
    %16 = arith.subf %15, %14 : vector<16x128xf32>
    %17 = arith.mulf %16, %16 : vector<16x128xf32>
    %cst_6 = arith.constant 2.500000e-01 : f32
    %18 = vector.broadcast %cst_6 : f32 to vector<16x128xf32>
    %19 = arith.mulf %18, %17 : vector<16x128xf32>
    %20 = arith.mulf %19, %11 : vector<16x128xf32>
    %21 = vector.shape_cast %20 : vector<16x128xf32> to vector<2x8x128xf32>
    %cst_7 = arith.constant dense<0.000000e+00> : vector<8x128xf32>
    %22 = vector.multi_reduction <add>, %21, %cst_7 [0] : vector<2x8x128xf32> to vector<8x128xf32>
    %c0_8 = arith.constant 0 : index
    %c0_9 = arith.constant 0 : index
    %23 = vector.load %arg3[%c0_8, %c0_9] : memref<8x128xf32, #tpu.memory_space<vmem>>, vector<8x128xf32>
    tpu.vector_store %arg3[%c0_8, %c0_9], %22 {strides = array<i32>} : memref<8x128xf32, #tpu.memory_space<vmem>>, vector<8x128xf32>,
    return
  }
  func.func @transform_0(%arg0: i32) -> (i32, i32) {
    %c0_i32 = arith.constant 0 : i32
    %c0_i32_0 = arith.constant 0 : i32
    return %arg0, %c0_i32 : i32, i32
  }
  func.func @transform_1(%arg0: i32) -> (i32, i32) {
    %c0_i32 = arith.constant 0 : i32
    %c0_i32_0 = arith.constant 0 : i32
    return %arg0, %c0_i32 : i32, i32
  }
  func.func @transform_2(%arg0: i32) -> (i32, i32) {
    %c0_i32 = arith.constant 0 : i32
    %c0_i32_0 = arith.constant 0 : i32
    return %arg0, %c0_i32 : i32, i32
  }
}

</mosaic_0001>

<bundles_post_ra>
// kernel: tpu_custom_call.1
= control target key start
LH: loop header
LB: loop body
LE: loop exit
PB: predicated region body
PF: predicated region fallthrough
CT: control target
= control target key end

     0   :  { %7 = vsyncpa [#allocation3], 0  ;;  %s240_s0 = inlined_call_operand.hbm [shape: f32[16,128], index: 0, kind: input, shape index: {}]   ;;  %s241_s1 = inlined_call_operand.hbm [shape: f32[16,128], index: 1, kind: input, shape index: {}]   ;;  %s242_s2 = inlined_call_operand.hbm [shape: f32[8,128], index: 2, kind: output, shape index: {}]  }
   0x1   :  { %8 = vsyncpa [#allocation6], 0 }
   0x2   :  { %9 = vsyncpa [#allocation4], 0  ;;  %s14_s11 = sshll.u32 %s240_s0, 4  ;;  %s211_s12 = smov [#allocation2]   ;;  %s15_s11 = int_to_ptr.hbm [resolvable:$true] %s14_s11 }
   0x3   :  { %s16_s13 = sshll.u32 %s211_s12, 4  ;;  %s27_s16 = sshll.u32 %s241_s1, 4  ;;  %s17_s13 = int_to_ptr.vmem [resolvable:$true] %s16_s13  ;;  %s28_s16 = int_to_ptr.hbm [resolvable:$true] %s27_s16 }
   0x4   :  { %s212_s17 = smov 128   ;;  %s213_s18 = smov 8  }
   0x5   :  { %22 = dma.hbm_to_vmem [thread:$0]  %s15_s11, 256, %s17_s13, [#allocation3], %s212_s17, %s212_s17, %s213_s18  }
   0x6   :  { %s214_s19 = smov [#allocation5]  }
   0x7   :  { %s29_s20 = sshll.u32 %s214_s19, 4  ;;  %s30_s20 = int_to_ptr.vmem [resolvable:$true] %s29_s20 }
   0x8   :  { %35 = dma.hbm_to_vmem [thread:$0]  %s28_s16, 256, %s30_s20, [#allocation6], %s212_s17, %s212_s17, %s213_s18  }
   0x9   :  { %205 = dma.done.wait [#allocation3], 256  }
   0xa   :  { %206 = vsyncadd [#allocation3], 4294967040 }
   0xb   :  { %207 = dma.done.wait [#allocation6], 256  }
   0xc   :  { %208 = vsyncadd [#allocation6], 4294967040  ;;  %v44_v0 = vld [vmem:[#allocation2] sm:$0xff]  ;;  %v45_v1 = vld [vmem:[#allocation2 + $0x8] sm:$0xff]  ;;  %s215_s0 = smov [#allocation7]   ;;  %s105_s23 = sshll.u32 %s242_s2, 4  ;;  %s106_s23 = int_to_ptr.hbm [resolvable:$true] %s105_s23 }
   0xd   :  { %v48_v2 = vand.u32 2147483647, %v44_v0  ;;  %v49_v3 = vand.u32 2147483647, %v45_v1  ;;  %v46_v12 = vld [vmem:[#allocation5] sm:$0xff]  ;;  %v47_v15 = vld [vmem:[#allocation5 + $0x8] sm:$0xff] }
   0xe   :  { %v56_v17 = vmax.f32 %v44_v0, 0.0  ;;  %v58_v18 = vmul.f32 %v46_v12, %v44_v0  ;;  %v57_v21 = vmax.f32 %v45_v1, 0.0  ;;  %v59_v22 = vmul.f32 %v47_v15, %v45_v1  ;;  %s103_s1 = sshll.u32 %s215_s0, 4  ;;  %s104_s1 = int_to_ptr.vmem [resolvable:$true] %s103_s1 }
   0xf   :  { %v50_v4 = vsub.f32 0.0, %v48_v2  ;;  %v51_v5 = vsub.f32 0.0, %v49_v3 }
  0x10   :  { %v60_v26 = vsub.f32 %v56_v17, %v58_v18  ;;  %v61_v29 = vsub.f32 %v57_v21, %v59_v22 }
  0x11   :  { %v52_v6 = vmul.f32 1.442695, %v50_v4  ;;  %v54_v7 = vmul.f32 1.442695, %v51_v5 }
  0x13   :  { %121 = vpow2.f32 %v52_v6 }
  0x14   :  { %123 = vpow2.f32 %v54_v7 }
  0x19   :  { %v122_v8 = vpop.eup %121 }
  0x1a   :  { %v124_v9 = vpop.eup %123  ;;  %v62_v10 = vadd.f32 1.0, %v122_v8  ;;  %v65_v11 = vmul.f32 -0.5, %v122_v8  ;;  %v68_v19 = vand.u32 2147483647, %v122_v8 }
  0x1b   :  { %v71_v13 = vadd.f32 1.0, %v124_v9  ;;  %v74_v14 = vmul.f32 -0.5, %v124_v9  ;;  %v77_v23 = vand.u32 2147483647, %v124_v9 }
  0x1c   :  { %125 = vlog2.f32 %v62_v10  ;;  %v66_v16 = vadd.f32 1.0, %v65_v11  ;;  %vm69_vm0 = vcmp.lt.f32.partialorder %v68_v19, 0.0004427343 }
  0x1d   :  { %127 = vlog2.f32 %v71_v13  ;;  %v75_v20 = vadd.f32 1.0, %v74_v14  ;;  %vm78_vm1 = vcmp.lt.f32.partialorder %v77_v23, 0.0004427343 }
  0x1e   :  { %v67_v24 = vmul.f32 %v122_v8, %v66_v16 }
  0x1f   :  { %v76_v27 = vmul.f32 %v124_v9, %v75_v20 }
  0x22   :  { %v126_v25 = vpop.eup %125 }
  0x23   :  { %v128_v28 = vpop.eup %127  ;;  %v64_v30 = vmul.f32 0.6931472, %v126_v25 }
  0x24   :  { %v73_v31 = vmul.f32 0.6931472, %v128_v28 }
  0x25   :  { %v70_v32 = vsel %vm69_vm0, %v67_v24, %v64_v30 }
  0x26   :  { %v79_v33 = vsel %vm78_vm1, %v76_v27, %v73_v31  ;;  %v80_v34 = vadd.f32 %v70_v32, %v60_v26 }
  0x27   :  { %v81_v35 = vadd.f32 %v79_v33, %v61_v29 }
  0x28   :  { %v82_v36 = vsub.f32 0.0, %v80_v34 }
  0x29   :  { %v83_v37 = vsub.f32 0.0, %v81_v35 }
  0x2a   :  { %v84_v38 = vmul.f32 1.442695, %v82_v36 }
  0x2b   :  { %v86_v39 = vmul.f32 1.442695, %v83_v37 }
  0x2c   :  { %129 = vpow2.f32 %v84_v38 }
  0x2d   :  { %131 = vpow2.f32 %v86_v39 }
  0x32   :  { %v130_v40 = vpop.eup %129 }
  0x33   :  { %v132_v41 = vpop.eup %131  ;;  %v88_v42 = vsub.f32 1.0, %v130_v40 }
  0x34   :  { %v89_v43 = vsub.f32 1.0, %v132_v41 }
  0x35   :  { %v90_v44 = vmul.f32 %v88_v42, %v88_v42 }
  0x36   :  { %v91_v45 = vmul.f32 %v89_v43, %v89_v43 }
  0x37   :  { %v92_v46 = vmul.f32 0.25, %v90_v44 }
  0x38   :  { %v93_v47 = vmul.f32 0.25, %v91_v45 }
  0x39   :  { %v94_v48 = vmul.f32 %v92_v46, %v80_v34 }
  0x3a   :  { %v95_v49 = vmul.f32 %v93_v47, %v81_v35 }
  0x3c   :  { %v96_v50 = vadd.f32 %v95_v49, %v94_v48 }
  0x3e   :  { %97 = vst [vmem:[#allocation7] sm:$0xff] %v96_v50 }
  0x3f   :  { %108 = dma.vmem_to_hbm [thread:$0]  %s104_s1, 128, %s106_s23, [#allocation4]  }
  0x40   :  { %209 = dma.done.wait [#allocation4], 128  }
  0x41   :  { %210 = vsyncadd [#allocation4], 4294967168 }
  0x42   :  { %113 = vsyncpa [#allocation3], 1 }
  0x43   :  { %114 = vsyncpa [#allocation6], 1 }
  0x44   :  { %115 = vsyncpa [#allocation4], 1 }

</bundles_post_ra>
